<compile_context>
chip_gen: v7x
topology: tpu7x:2x2x1
jax: 0.10.0
libtpu: 0.0.40
codegen_flags: <defaults>
</compile_context>

<pallas_src>
import functools

import jax
import jax.numpy as jnp
from jax.experimental import pallas as pl
from jax.experimental.pallas import tpu as pltpu

_VMEM_LIMIT = 32 * 1024 * 1024  # plenty for per-layer streamed weights at W=256


# ----------------------------- in-kernel helpers -----------------------------
def _layernorm(x_f32, gamma, beta, eps=1e-5):
    """LayerNorm in f32 with single-pass variance: mean(x^2) - mu^2."""
    mu = jnp.mean(x_f32, axis=-1, keepdims=True)
    ms = jnp.mean(x_f32 * x_f32, axis=-1, keepdims=True)
    inv = jax.lax.rsqrt(ms - mu * mu + eps)
    return (x_f32 - mu) * inv * gamma.astype(jnp.float32) + beta.astype(jnp.float32)


def _erf(x):
    # Abramowitz & Stegun 7.1.26 (|err| < 1.5e-7): only mul/add/exp, always lowers.
    a1, a2, a3, a4, a5 = 0.254829592, -0.284496736, 1.421413741, -1.453152027, 1.061405429
    ax = jnp.abs(x)
    t = 1.0 / (1.0 + 0.3275911 * ax)
    poly = ((((a5 * t + a4) * t + a3) * t + a2) * t + a1) * t
    y = 1.0 - poly * jnp.exp(-(ax * ax))
    return jnp.where(x < 0.0, -y, y)


def _gelu_exact(x_f32):
    # nn.GELU() default = exact (erf) GELU
    return 0.5 * x_f32 * (1.0 + _erf(x_f32 * 0.7071067811865476))


def _dot(a, b):
    return jax.lax.dot_general(a, b, (((a.ndim - 1,), (0,)), ((), ())),
                               preferred_element_type=jnp.float32)


def _dot_nt(a, b):  # a @ b.T without materializing the transpose
    return jax.lax.dot_general(a, b, (((1,), (1,)), ((), ())),
                               preferred_element_type=jnp.float32)


def _mha_fused(q, k, v, wo_t, n_head, cdt):
    """Multi-head attention with the output projection fused per head.

    q: (N, E) f32 (1/sqrt(hd) already folded into W_q), k/v: (M, E) f32,
    wo_t: (E, E) = W_o^T in compute dtype.  Returns (N, E) f32 (no bias).
    No concat of per-head contexts -> no masked partial stores.
    """
    _, e = q.shape
    hd = e // n_head
    att = None
    for h in range(n_head):
        lo = h * hd
        qh = q[:, lo:lo + hd].astype(cdt)
        kh = k[:, lo:lo + hd].astype(cdt)
        vh = v[:, lo:lo + hd].astype(cdt)
        s = _dot_nt(qh, kh)                                    # (N, M) f32
        s = s - jnp.max(s, axis=-1, keepdims=True)
        p = jnp.exp(s)
        p = p * pl.reciprocal(jnp.sum(p, axis=-1, keepdims=True), approx=False)
        ctx = _dot(p.astype(cdt), vh)                          # (N, hd) f32
        contrib = _dot(ctx.astype(cdt), wo_t[lo:lo + hd, :])   # (N, E)  f32
        att = contrib if att is None else att + contrib
    return att


# --------------------------- decoder-layer kernel ----------------------------
def _decoder_layer_kernel(
    x0_ref, mem_ref,
    n1g_ref, n1b_ref, sa_wq_ref, sa_wk_ref, sa_wv_ref, sa_wo_ref, sa_bo_ref,
    n2g_ref, n2b_ref, ca_wq_ref, ca_wk_ref, ca_wv_ref, ca_wo_ref, ca_bo_ref,
    n3g_ref, n3b_ref, fc_w_ref, fc_b_ref, pr_w_ref, pr_b_ref,
    out_ref, *, n_head,
):
    """One TransformerDecoderLayer.  grid = (batch, layer), layer innermost."""
    layer = pl.program_id(1)

    # out_ref carries the residual stream; it stays VMEM-resident across the
    # (arbitrary) layer axis, so initialize it from the projected text once.
    @pl.when(layer == 0)
    def _init():
        out_ref[...] = x0_ref[...]

    cdt = x0_ref.dtype                       # MXU compute dtype (bf16-able)
    x = out_ref[0].astype(jnp.float32)       # (N, W) residual stream, f32
    mem = mem_ref[0].astype(cdt)             # (M, W)

    # ---------------- self attention: q = k = v = LN1(x) ----------------
    h = _layernorm(x, n1g_ref[0], n1b_ref[0]).astype(cdt)
    q = _dot(h, sa_wq_ref[0])                # scale folded into W_q, no bias
    k = _dot(h, sa_wk_ref[0])
    v = _dot(h, sa_wv_ref[0])
    x = x + _mha_fused(q, k, v, sa_wo_ref[0], n_head, cdt) \
          + sa_bo_ref[0].astype(jnp.float32)

    # ---------------- cross attention: kv = projected visual memory ------
    h = _layernorm(x, n2g_ref[0], n2b_ref[0]).astype(cdt)
    q = _dot(h, ca_wq_ref[0])
    k = _dot(mem, ca_wk_ref[0])
    v = _dot(mem, ca_wv_ref[0])
    x = x + _mha_fused(q, k, v, ca_wo_ref[0], n_head, cdt) \
          + ca_bo_ref[0].astype(jnp.float32)

    # ---------------- MLP: Linear -> exact GELU -> Linear ----------------
    h = _layernorm(x, n3g_ref[0], n3b_ref[0]).astype(cdt)
    fc = _dot(h, fc_w_ref[0]) + fc_b_ref[0].astype(jnp.float32)
    g = _gelu_exact(fc).astype(cdt)
    x = x + _dot(g, pr_w_ref[0]) + pr_b_ref[0].astype(jnp.float32)

    out_ref[0] = x.astype(out_ref.dtype)


# ------------------------- LN -> Linear (-> LN) kernel ------------------------
def _ln_linear_kernel(x_ref, g1_ref, b1_ref, w_ref, bias_ref, g2_ref, b2_ref,
                      out_ref, *, second_ln):
    cdt = x_ref.dtype
    x = x_ref[0].astype(jnp.float32)                          # (T, Cin)
    h = _layernorm(x, g1_ref[...], b1_ref[...]).astype(cdt)
    y = _dot(h, w_ref[...]) + bias_ref[...].astype(jnp.float32)
    if second_ln:
        y = _layernorm(y, g2_ref[...], b2_ref[...])
    out_ref[0] = y.astype(out_ref.dtype)


# --------------------------------- wrappers ----------------------------------
def _ln_linear_call(x, g1, b1, w, b, g2=None, b2=None):
    """Per-batch LN -> Linear (-> LN).  x: (B, T, Cin), w: (Cout, Cin)."""
    bsz, t, cin = x.shape
    cout = w.shape[0]
    cdt = x.dtype
    second_ln = g2 is not None
    if not second_ln:
        g2 = jnp.ones((cout,), cdt)
        b2 = jnp.zeros((cout,), cdt)
    params = [g1.reshape(1, cin), b1.reshape(1, cin),
              w.T.astype(cdt), b.reshape(1, cout),
              g2.reshape(1, cout), b2.reshape(1, cout)]

    def _const_spec(a):
        nd = a.ndim
        return pl.BlockSpec(a.shape, lambda b_, _nd=nd: (0,) * _nd)

    return pl.pallas_call(
        functools.partial(_ln_linear_kernel, second_ln=second_ln),
        out_shape=jax.ShapeDtypeStruct((bsz, t, cout), x.dtype),
        grid_spec=pltpu.PrefetchScalarGridSpec(
            num_scalar_prefetch=0,
            grid=(bsz,),
            in_specs=[pl.BlockSpec((1, t, cin), lambda b_: (b_, 0, 0))]
                     + [_const_spec(a) for a in params],
            out_specs=pl.BlockSpec((1, t, cout), lambda b_: (b_, 0, 0)),
        ),
        compiler_params=pltpu.CompilerParams(
            dimension_semantics=("parallel",),
            vmem_limit_bytes=_VMEM_LIMIT),
    )(x, *params)


def _decoder_stack_call(x, mem, layers, n_head):
    """Runs all decoder layers in one pallas_call.  x: (B,N,W), mem: (B,M,W)."""
    bsz, n, w = x.shape
    m = mem.shape[1]
    n_layers = len(layers)
    cdt = x.dtype
    scale = float((w // n_head) ** -0.5)

    def stk(f):
        return jnp.stack([f(lp) for lp in layers], axis=0)

    def v2(a):  # (D,) -> (1, D) so stacked shape is (L, 1, D): lane-friendly blocks
        return a.reshape(1, -1)

    p = [
        stk(lambda lp: v2(lp["n1g"])), stk(lambda lp: v2(lp["n1b"])),
        stk(lambda lp: (scale * lp["sa"]["wq"]).T.astype(cdt)),
        stk(lambda lp: lp["sa"]["wk"].T.astype(cdt)),
        stk(lambda lp: lp["sa"]["wv"].T.astype(cdt)),
        stk(lambda lp: lp["sa"]["wo"].T.astype(cdt)),
        stk(lambda lp: v2(lp["sa"]["bo"])),
        stk(lambda lp: v2(lp["n2g"])), stk(lambda lp: v2(lp["n2b"])),
        stk(lambda lp: (scale * lp["ca"]["wq"]).T.astype(cdt)),
        stk(lambda lp: lp["ca"]["wk"].T.astype(cdt)),
        stk(lambda lp: lp["ca"]["wv"].T.astype(cdt)),
        stk(lambda lp: lp["ca"]["wo"].T.astype(cdt)),
        stk(lambda lp: v2(lp["ca"]["bo"])),
        stk(lambda lp: v2(lp["n3g"])), stk(lambda lp: v2(lp["n3b"])),
        stk(lambda lp: lp["wfc"].T.astype(cdt)), stk(lambda lp: v2(lp["bfc"])),
        stk(lambda lp: lp["wpr"].T.astype(cdt)), stk(lambda lp: v2(lp["bpr"])),
    ]

    def _lspec(a):
        nd = a.ndim
        return pl.BlockSpec((1,) + a.shape[1:],
                            lambda b_, l_, _nd=nd: (l_,) + (0,) * (_nd - 1))

    return pl.pallas_call(
        functools.partial(_decoder_layer_kernel, n_head=n_head),
        out_shape=jax.ShapeDtypeStruct((bsz, n, w), x.dtype),
        grid_spec=pltpu.PrefetchScalarGridSpec(
            num_scalar_prefetch=0,
            grid=(bsz, n_layers),                 # layer axis innermost
            in_specs=[pl.BlockSpec((1, n, w), lambda b_, l_: (b_, 0, 0)),
                      pl.BlockSpec((1, m, w), lambda b_, l_: (b_, 0, 0))]
                     + [_lspec(a) for a in p],
            out_specs=pl.BlockSpec((1, n, w), lambda b_, l_: (b_, 0, 0)),
        ),
        compiler_params=pltpu.CompilerParams(
            dimension_semantics=("parallel", "arbitrary"),
            vmem_limit_bytes=_VMEM_LIMIT),
    )(x, mem, *p)


def context_decoder(text, visual, params, n_head):
    """ContextDecoder.forward.  text: (B, N, C), visual: (B, M, C) -> (B, N, C)."""
    mp = params["memory_proj"]
    mem = _ln_linear_call(visual, mp["g1"], mp["b1"], mp["w"], mp["b"],
                          mp["g2"], mp["b2"])
    tp = params["text_proj"]
    x = _ln_linear_call(text, tp["g1"], tp["b1"], tp["w"], tp["b"])
    x = _decoder_stack_call(x, mem, params["layers"], n_head)
    op = params["out_proj"]
    return _ln_linear_call(x, op["g1"], op["b1"], op["w"], op["b"])


# ----------------------------- pure-JAX reference ----------------------------
def _reference(text, visual, params, n_head):
    def ln(v, g, b, eps=1e-5):
        mu = jnp.mean(v, -1, keepdims=True)
        var = jnp.mean((v - mu) ** 2, -1, keepdims=True)
        return (v - mu) * jax.lax.rsqrt(var + eps) * g + b

    def attention(q_in, kv_in, p):
        bsz, nq, c = q_in.shape
        mk = kv_in.shape[1]
        hd = c // n_head
        scale = hd ** -0.5
        q = (q_in @ p["wq"].T).reshape(bsz, nq, n_head, hd)
        k = (kv_in @ p["wk"].T).reshape(bsz, mk, n_head, hd)
        v = (kv_in @ p["wv"].T).reshape(bsz, mk, n_head, hd)
        attn = jnp.einsum('bnkc,bmkc->bknm', q, k) * scale
        attn = jax.nn.softmax(attn, axis=-1)
        ctx = jnp.einsum('bknm,bmkc->bnkc', attn, v).reshape(bsz, nq, c)
        return ctx @ p["wo"].T + p["bo"]

    mp = params["memory_proj"]
    mem = ln(visual, mp["g1"], mp["b1"]) @ mp["w"].T + mp["b"]
    mem = ln(mem, mp["g2"], mp["b2"])
    tp = params["text_proj"]
    x = ln(text, tp["g1"], tp["b1"]) @ tp["w"].T + tp["b"]
    for lp in params["layers"]:
        h = ln(x, lp["n1g"], lp["n1b"])
        x = x + attention(h, h, lp["sa"])
        h = ln(x, lp["n2g"], lp["n2b"])
        x = x + attention(h, mem, lp["ca"])
        h = ln(x, lp["n3g"], lp["n3b"])
        fc = h @ lp["wfc"].T + lp["bfc"]
        g = 0.5 * fc * (1.0 + jax.lax.erf(fc / jnp.sqrt(2.0).astype(fc.dtype)))
        x = x + (g @ lp["wpr"].T + lp["bpr"])
    op = params["out_proj"]
    return ln(x, op["g1"], op["b1"]) @ op["w"].T + op["b"]


# ---------------------------------- params -----------------------------------
def make_params(key, visual_dim, width, n_layers, dtype=jnp.float32):
    keys = iter(jax.random.split(key, 512))
    nk = lambda: next(keys)

    def w_(shape, s=0.1):
        return (s * jax.random.normal(nk(), shape)).astype(dtype)

    def ln_(dim):
        g = (1.0 + 0.05 * jax.random.normal(nk(), (dim,))).astype(dtype)
        return g, w_((dim,), 0.05)

    def attn_(dim):
        return {"wq": w_((dim, dim)), "wk": w_((dim, dim)), "wv": w_((dim, dim)),
                "wo": w_((dim, dim)), "bo": w_((dim,), 0.05)}

    mg1, mb1 = ln_(visual_dim)
    mg2, mb2 = ln_(width)
    tg1, tb1 = ln_(visual_dim)
    og1, ob1 = ln_(width)
    layers = []
    for _ in range(n_layers):
        n1g, n1b = ln_(width)
        n2g, n2b = ln_(width)
        n3g, n3b = ln_(width)
        layers.append({
            "n1g": n1g, "n1b": n1b, "n2g": n2g, "n2b": n2b, "n3g": n3g, "n3b": n3b,
            "sa": attn_(width), "ca": attn_(width),
            "wfc": w_((4 * width, width)), "bfc": w_((4 * width,), 0.05),
            "wpr": w_((width, 4 * width)), "bpr": w_((width,), 0.05),
        })
    return {
        "memory_proj": {"g1": mg1, "b1": mb1, "w": w_((width, visual_dim)),
                        "b": w_((width,), 0.05), "g2": mg2, "b2": mb2},
        "text_proj": {"g1": tg1, "b1": tb1, "w": w_((width, visual_dim)),
                      "b": w_((width,), 0.05)},
        "layers": layers,
        "out_proj": {"g1": og1, "b1": ob1, "w": w_((visual_dim, width)),
                     "b": w_((visual_dim,), 0.05)},
    }


# ------------------------------------ main ------------------------------------
if __name__ == "__main__":
    visual_dim = 32     # CLIP feature dim (256 in the real model)
    width = 32          # transformer_width (256 in the real model)
    n_head = 4          # transformer_heads
    n_layers = 2        # transformer_layers (6 in the real model)
    batch, n_text, n_vis = 2, 8, 16

    key = jax.random.PRNGKey(0)
    k_text, k_vis, k_par = jax.random.split(key, 3)
    text = jax.random.normal(k_text, (batch, n_text, visual_dim), jnp.float32)
    visual = jax.random.normal(k_vis, (batch, n_vis, visual_dim), jnp.float32)
    params = make_params(k_par, visual_dim, width, n_layers)

    out = context_decoder(text, visual, params, n_head)
    out = jax.block_until_ready(out)

    ref = _reference(text, visual, params, n_head)
    assert out.shape == (batch, n_text, visual_dim)
    max_err = float(jnp.max(jnp.abs(out - ref)))
    assert jnp.allclose(out, ref, atol=1e-3, rtol=1e-3), \
        f"mismatch vs reference (max abs err {max_err})"

    print("KERNEL_OK")
</pallas_src>

<mosaic_0001>
module attributes {stable_mosaic.version = 11 : i64} {
  func.func @_ln_linear_kernel(%arg0: i32, %arg1: memref<1x16x32xf32, #tpu.memory_space<vmem>>, %arg2: memref<1x32xf32, #tpu.memory_space<vmem>>, %arg3: memref<1x32xf32, #tpu.memory_space<vmem>>, %arg4: memref<32x32xf32, #tpu.memory_space<vmem>>, %arg5: memref<1x32xf32, #tpu.memory_space<vmem>>, %arg6: memref<1x32xf32, #tpu.memory_space<vmem>>, %arg7: memref<1x32xf32, #tpu.memory_space<vmem>>, %arg8: memref<1x16x32xf32, #tpu.memory_space<vmem>>) attributes {dimension_semantics = [#tpu.dimension_semantics<parallel>], iteration_bounds = array<i64: 2>, scalar_prefetch = 0 : i64, scratch_operands = 0 : i64, tpu.core_type = #tpu.core_type<tc>, window_params = [{transform_indices = @transform_0, window_bounds = array<i64: 1, 16, 32>}, {pipeline_mode = #tpu.pipeline_mode<synchronous>, transform_indices = @transform_1, window_bounds = array<i64: 1, 32>}, {pipeline_mode = #tpu.pipeline_mode<synchronous>, transform_indices = @transform_2, window_bounds = array<i64: 1, 32>}, {pipeline_mode = #tpu.pipeline_mode<synchronous>, transform_indices = @transform_3, window_bounds = array<i64: 32, 32>}, {pipeline_mode = #tpu.pipeline_mode<synchronous>, transform_indices = @transform_4, window_bounds = array<i64: 1, 32>}, {pipeline_mode = #tpu.pipeline_mode<synchronous>, transform_indices = @transform_5, window_bounds = array<i64: 1, 32>}, {pipeline_mode = #tpu.pipeline_mode<synchronous>, transform_indices = @transform_6, window_bounds = array<i64: 1, 32>}, {transform_indices = @transform_7, window_bounds = array<i64: 1, 16, 32>}]} {
    %c0 = arith.constant 0 : index
    %c0_0 = arith.constant 0 : index
    %c0_1 = arith.constant 0 : index
    %0 = vector.load %arg1[%c0, %c0_0, %c0_1] : memref<1x16x32xf32, #tpu.memory_space<vmem>>, vector<1x16x32xf32>
    %1 = vector.shape_cast %0 : vector<1x16x32xf32> to vector<16x32xf32>
    %c0_2 = arith.constant 0 : index
    %c0_3 = arith.constant 0 : index
    %2 = vector.load %arg2[%c0_2, %c0_3] : memref<1x32xf32, #tpu.memory_space<vmem>>, vector<1x32xf32>
    %c0_4 = arith.constant 0 : index
    %c0_5 = arith.constant 0 : index
    %3 = vector.load %arg3[%c0_4, %c0_5] : memref<1x32xf32, #tpu.memory_space<vmem>>, vector<1x32xf32>
    %cst = arith.constant dense<0.000000e+00> : vector<16xf32>
    %4 = vector.multi_reduction <add>, %1, %cst [1] : vector<16x32xf32> to vector<16xf32>
    %5 = vector.shape_cast %4 : vector<16xf32> to vector<16x1xf32>
    %cst_6 = arith.constant 3.200000e+01 : f32
    %6 = vector.broadcast %cst_6 : f32 to vector<16x1xf32>
    %7 = arith.divf %5, %6 : vector<16x1xf32>
    %8 = arith.mulf %1, %1 : vector<16x32xf32>
    %cst_7 = arith.constant dense<0.000000e+00> : vector<16xf32>
    %9 = vector.multi_reduction <add>, %8, %cst_7 [1] : vector<16x32xf32> to vector<16xf32>
    %10 = vector.shape_cast %9 : vector<16xf32> to vector<16x1xf32>
    %cst_8 = arith.constant 3.200000e+01 : f32
    %11 = vector.broadcast %cst_8 : f32 to vector<16x1xf32>
    %12 = arith.divf %10, %11 : vector<16x1xf32>
    %13 = arith.mulf %7, %7 : vector<16x1xf32>
    %14 = arith.subf %12, %13 : vector<16x1xf32>
    %cst_9 = arith.constant 9.99999974E-6 : f32
    %15 = vector.broadcast %cst_9 : f32 to vector<16x1xf32>
    %16 = arith.addf %14, %15 : vector<16x1xf32>
    %17 = math.rsqrt %16 : vector<16x1xf32>
    %18 = vector.broadcast %7 : vector<16x1xf32> to vector<16x32xf32>
    %19 = arith.subf %1, %18 : vector<16x32xf32>
    %20 = vector.broadcast %17 : vector<16x1xf32> to vector<16x32xf32>
    %21 = arith.mulf %19, %20 : vector<16x32xf32>
    %22 = vector.broadcast %2 : vector<1x32xf32> to vector<16x32xf32>
    %23 = arith.mulf %21, %22 : vector<16x32xf32>
    %24 = vector.broadcast %3 : vector<1x32xf32> to vector<16x32xf32>
    %25 = arith.addf %23, %24 : vector<16x32xf32>
    %c0_10 = arith.constant 0 : index
    %c0_11 = arith.constant 0 : index
    %26 = vector.load %arg4[%c0_10, %c0_11] : memref<32x32xf32, #tpu.memory_space<vmem>>, vector<32x32xf32>
    %cst_12 = arith.constant dense<0.000000e+00> : vector<16x32xf32>
    %27 = tpu.matmul %25, %26, %cst_12 {dimension_numbers = #tpu.dot_dimension_numbers<[1], [0], [0], [1], [0, 0, 1, 1], [], []>} : vector<16x32xf32>, vector<32x32xf32>, vector<16x32xf32> -> vector<16x32xf32>
    %c0_13 = arith.constant 0 : index
    %c0_14 = arith.constant 0 : index
    %28 = vector.load %arg5[%c0_13, %c0_14] : memref<1x32xf32, #tpu.memory_space<vmem>>, vector<1x32xf32>
    %29 = vector.broadcast %28 : vector<1x32xf32> to vector<16x32xf32>
    %30 = arith.addf %27, %29 : vector<16x32xf32>
    %c0_15 = arith.constant 0 : index
    %c0_16 = arith.constant 0 : index
    %31 = vector.load %arg6[%c0_15, %c0_16] : memref<1x32xf32, #tpu.memory_space<vmem>>, vector<1x32xf32>
    %c0_17 = arith.constant 0 : index
    %c0_18 = arith.constant 0 : index
    %32 = vector.load %arg7[%c0_17, %c0_18] : memref<1x32xf32, #tpu.memory_space<vmem>>, vector<1x32xf32>
    %cst_19 = arith.constant dense<0.000000e+00> : vector<16xf32>
    %33 = vector.multi_reduction <add>, %30, %cst_19 [1] : vector<16x32xf32> to vector<16xf32>
    %34 = vector.shape_cast %33 : vector<16xf32> to vector<16x1xf32>
    %cst_20 = arith.constant 3.200000e+01 : f32
    %35 = vector.broadcast %cst_20 : f32 to vector<16x1xf32>
    %36 = arith.divf %34, %35 : vector<16x1xf32>
    %37 = arith.mulf %30, %30 : vector<16x32xf32>
    %cst_21 = arith.constant dense<0.000000e+00> : vector<16xf32>
    %38 = vector.multi_reduction <add>, %37, %cst_21 [1] : vector<16x32xf32> to vector<16xf32>
    %39 = vector.shape_cast %38 : vector<16xf32> to vector<16x1xf32>
    %cst_22 = arith.constant 3.200000e+01 : f32
    %40 = vector.broadcast %cst_22 : f32 to vector<16x1xf32>
    %41 = arith.divf %39, %40 : vector<16x1xf32>
    %42 = arith.mulf %36, %36 : vector<16x1xf32>
    %43 = arith.subf %41, %42 : vector<16x1xf32>
    %cst_23 = arith.constant 9.99999974E-6 : f32
    %44 = vector.broadcast %cst_23 : f32 to vector<16x1xf32>
    %45 = arith.addf %43, %44 : vector<16x1xf32>
    %46 = math.rsqrt %45 : vector<16x1xf32>
    %47 = vector.broadcast %36 : vector<16x1xf32> to vector<16x32xf32>
    %48 = arith.subf %30, %47 : vector<16x32xf32>
    %49 = vector.broadcast %46 : vector<16x1xf32> to vector<16x32xf32>
    %50 = arith.mulf %48, %49 : vector<16x32xf32>
    %51 = vector.broadcast %31 : vector<1x32xf32> to vector<16x32xf32>
    %52 = arith.mulf %50, %51 : vector<16x32xf32>
    %53 = vector.broadcast %32 : vector<1x32xf32> to vector<16x32xf32>
    %54 = arith.addf %52, %53 : vector<16x32xf32>
    %c0_24 = arith.constant 0 : index
    %c0_25 = arith.constant 0 : index
    %c0_26 = arith.constant 0 : index
    %55 = vector.load %arg8[%c0_24, %c0_25, %c0_26] : memref<1x16x32xf32, #tpu.memory_space<vmem>>, vector<1x16x32xf32>
    %56 = vector.shape_cast %55 : vector<1x16x32xf32> to vector<16x32xf32>
    %57 = vector.shape_cast %54 : vector<16x32xf32> to vector<1x16x32xf32>
    tpu.vector_store %arg8[%c0_24, %c0_25, %c0_26], %57 {strides = array<i32>} : memref<1x16x32xf32, #tpu.memory_space<vmem>>, vector<1x16x32xf32>,
    return
  }
  func.func @transform_0(%arg0: i32) -> (i32, i32, i32) {
    %c0_i32 = arith.constant 0 : i32
    %c0_i32_0 = arith.constant 0 : i32
    %c0_i32_1 = arith.constant 0 : i32
    return %arg0, %c0_i32, %c0_i32_0 : i32, i32, i32
  }
  func.func @transform_1(%arg0: i32) -> (i32, i32) {
    %c0_i32 = arith.constant 0 : i32
    %c0_i32_0 = arith.constant 0 : i32
    %c0_i32_1 = arith.constant 0 : i32
    return %c0_i32, %c0_i32_0 : i32, i32
  }
  func.func @transform_2(%arg0: i32) -> (i32, i32) {
    %c0_i32 = arith.constant 0 : i32
    %c0_i32_0 = arith.constant 0 : i32
    %c0_i32_1 = arith.constant 0 : i32
    return %c0_i32, %c0_i32_0 : i32, i32
  }
  func.func @transform_3(%arg0: i32) -> (i32, i32) {
    %c0_i32 = arith.constant 0 : i32
    %c0_i32_0 = arith.constant 0 : i32
    %c0_i32_1 = arith.constant 0 : i32
    return %c0_i32, %c0_i32_0 : i32, i32
  }
  func.func @transform_4(%arg0: i32) -> (i32, i32) {
    %c0_i32 = arith.constant 0 : i32
    %c0_i32_0 = arith.constant 0 : i32
    %c0_i32_1 = arith.constant 0 : i32
    return %c0_i32, %c0_i32_0 : i32, i32
  }
  func.func @transform_5(%arg0: i32) -> (i32, i32) {
    %c0_i32 = arith.constant 0 : i32
    %c0_i32_0 = arith.constant 0 : i32
    %c0_i32_1 = arith.constant 0 : i32
    return %c0_i32, %c0_i32_0 : i32, i32
  }
  func.func @transform_6(%arg0: i32) -> (i32, i32) {
    %c0_i32 = arith.constant 0 : i32
    %c0_i32_0 = arith.constant 0 : i32
    %c0_i32_1 = arith.constant 0 : i32
    return %c0_i32, %c0_i32_0 : i32, i32
  }
  func.func @transform_7(%arg0: i32) -> (i32, i32, i32) {
    %c0_i32 = arith.constant 0 : i32
    %c0_i32_0 = arith.constant 0 : i32
    %c0_i32_1 = arith.constant 0 : i32
    return %arg0, %c0_i32, %c0_i32_0 : i32, i32, i32
  }
}

</mosaic_0001>

<bundles_post_ra>
// kernel: tpu_custom_call.1
= control target key start
LH: loop header
LB: loop body
LE: loop exit
PB: predicated region body
PF: predicated region fallthrough
CT: control target
= control target key end

     0   :  { %12 = vsyncpa [#allocation3], 0  ;;  %s1137_s0 = inlined_call_operand.hbm [shape: f32[2,16,32], index: 0, kind: input, shape index: {}]   ;;  %s1138_s1 = inlined_call_operand.vmem [shape: f32[1,32], index: 1, kind: input, shape index: {}]   ;;  %s1139_s2 = inlined_call_operand.vmem [shape: f32[1,32], index: 2, kind: input, shape index: {}]   ;;  %s1140_s3 = inlined_call_operand.hbm [shape: f32[32,32], index: 3, kind: input, shape index: {}]   ;;  %s1141_s4 = inlined_call_operand.vmem [shape: f32[1,32], index: 4, kind: input, shape index: {}]   ;;  %s1142_s5 = inlined_call_operand.vmem [shape: f32[1,32], index: 5, kind: input, shape index: {}]   ;;  %s1143_s6 = inlined_call_operand.vmem [shape: f32[1,32], index: 6, kind: input, shape index: {}]   ;;  %s1144_s7 = inlined_call_operand.hbm [shape: f32[2,16,32], index: 7, kind: output, shape index: {}]  }
   0x1   :  { %14 = vsyncpa [#allocation3 + $0x1], 0 }
   0x2   :  { %15 = vsyncpa [#allocation6], 0 }
   0x3   :  { %16 = vsyncpa [#allocation4], 0 }
   0x4   :  { %18 = vsyncpa [#allocation4 + $0x1], 0  ;;  %s899_s24 = smov 0   ;;  %s901_s25 = smov 0  }
   0x5   :  { %s903_s26 = smov 0   ;;  %s905_s27 = smov 0  }
   0x6 LB: > { %s920_s28 = sadd.s32 4294967295, %s850_s27   ;;  %s603_s29 = sadd.s32 4294967294, %s850_s27   ;;  %s850_s27 = sphi %s905_s27, %s1166_s27   ;;  %s846_s26 = sphi %s903_s26, %s1165_s26   ;;  %s842_s25 = sphi %s901_s25, %s1164_s25   ;;  %s838_s24 = sphi %s899_s24, %s1163_s24  }
   0x7   : > { %p44_p0 = scmp.ne.s32.totalorder %s842_s25, %s838_s24  ;;  %p1145_p1 = scmp.eq.s32.totalorder %s920_s28, 0 }
   0x8   : > { %p200_p3 = scmp.eq.s32.totalorder %s603_s29, 1  ;;  %p604_p5 = scmp.ge.s32.totalorder %s850_s27, 1 }
   0x9   : > { %p929_p4 = por %p1145_p1, %p44_p0  ;;  %p207_p7 = scmp.lt.s32.totalorder %s850_s27, 3 }
   0xa   : > { %p934_p6 = por %p200_p3, %p44_p0  ;;  %s852_s10 = smov [#allocation5]  }
   0xb   : > { %s1149_s30 = scalar_select %p929_p4, 1, 0 }
   0xc   : > { %s1150_s8 = scalar_select %p934_p6, 1, 0 }
   0xd   : > { %p939_p8 = pnand %p604_p5, %p207_p7  ;;  %s225_s11 = sshll.u32 %s852_s10, 4  ;;  %s943_s11 = int_to_ptr.vmem [resolvable:$true] %s225_s11 }
   0xe   : > { %s955_s13 = sadd.s32 1, %s850_s27   ;;  %s31_s14 = sadd.s32 1, %s846_s26 }
   0xf   : > { %s1151_s9 = scalar_select %p939_p8, 1, 0 }
  0x10   : > { %p661_p9 = pneg %p939_p8  ;;  %s28_s15 = ssub.s32 %s850_s27, %s955_s13 }
  0x11   : > { %s722_s18 = scalar_lea.hbm %s1140_s3, 512 }
  0x12   : > { %p950_p11 = pnand %p661_p9, %p1145_p1  ;;  %p723_p12 = scmp.ne.s32.totalorder %s1140_s3, %s722_s18 }
  0x13   : > { %p729_p5 = scmp.lt.u32.totalorder %s722_s18, %s1140_s3 }
  0x14   : > { %p724_p13 = pneg %p950_p11 }
  0x16   : > { %p725_p0 = pnand %p724_p13, %p723_p12 }
  0x18   : > { %p726_p3 = pneg %p725_p0 }
  0x1a   : > { %p731_p7 = pnand %p729_p5, %p726_p3 }
  0x1c   : > { %734 = shalt.err (!%p731_p7)
}
  0x1d   : > { %s735_s23 = scalar_lea.vmem %s943_s11, 512  ;;  %p743_p2 = scmp.lt.s32.totalorder %s943_s11, %s943_s11 }
  0x1e   : > { %p736_p9 = scmp.ne.s32.totalorder %s943_s11, %s735_s23  ;;  %p744_p6 = scmp.lt.s32.totalorder %s735_s23, %s735_s23 }
  0x20   : > { %p738_p10 = pnand %p736_p9, %p724_p13  ;;  %p745_p4 = por %p744_p6, %p743_p2 }
  0x22   : > { %p739_p1 = pneg %p738_p10 }
  0x24   : > { %p746_p8 = pnand %p745_p4, %p739_p1 }
  0x26   : > { %749 = shalt.err (!%p746_p8)
}
  0x27   : > { %s1148_s29 = smov 128   ;;  %s854_s10 = smov 8  }
  0x28   : > { %664 = dma.hbm_to_vmem [thread:$0]  (!%p950_p11), %s1140_s3, 512, %s943_s11, [#allocation6], %s1148_s29, %s1148_s29, %s854_s10  }
  0x29   : > { %p29_p1 = scmp.eq.s32.totalorder %s28_s15, 0  ;;  %p38_p2 = scmp.ne.s32.totalorder %s846_s26, %s842_s25 }
  0x2a   : > { %p39_p4 = scmp.eq.s32.totalorder %s850_s27, 0  ;;  %p674_p6 = scmp.lt.s32.totalorder %s850_s27, 2 }
  0x2b   : > { %s989_s18 = scalar_select %p29_p1, %s846_s26, %s31_s14  }
  0x2c   : > { %p40_p8 = por %p39_p4, %p38_p2  ;;  %p1153_p10 = scmp.eq.s32.totalorder %s920_s28, 1 }
  0x2d   : > { %s248_s12 = sand.u32 1, %s846_s26   ;;  %s626_s20 = sshll.u32 %s850_s27, 8 }
  0x2e   : > { %p993_p12 = por %p1153_p10, %p38_p2  ;;  %s607_s21 = sshll.u32 %s248_s12, 4 }
  0x2f   : > { %s1002_s16 = scalar_lea.hbm %s1137_s0, %s626_s20  ;;  %s252_s11 = scalar_lea.vmem [#allocation2], %s607_s21 }
  0x30   : > { %s259_s14 = sshll.u32 %s252_s11, 4  ;;  %p1004_p11 = pnand %p674_p6, %p40_p8  ;;  %s1008_s14 = int_to_ptr.vmem [resolvable:$true] %s259_s14 }
  0x31   : > { %s1010_s17 = scalar_lea.sflag [#allocation3], %s248_s12  ;;  %s750_s29 = scalar_lea.hbm %s1002_s16, 256 }
  0x32   : > { %p751_p13 = scmp.ne.s32.totalorder %s1002_s16, %s750_s29  ;;  %p752_p0 = pneg %p1004_p11 }
  0x33   : > { %s755_s22 = scalar_lea.hbm %s1137_s0, 512  ;;  %p756_p7 = scmp.lt.u32.totalorder %s1002_s16, %s1137_s0 }
  0x34   : > { %p753_p3 = pnand %p752_p0, %p751_p13  ;;  %p757_p9 = scmp.lt.u32.totalorder %s755_s22, %s750_s29 }
  0x35   : > { %p759_p2 = scmp.lt.u32.totalorder %s750_s29, %s1002_s16 }
  0x36   : > { %p754_p5 = pneg %p753_p3  ;;  %p758_p1 = por %p757_p9, %p756_p7 }
  0x38   : > { %p760_p4 = por %p759_p2, %p758_p1 }
  0x3a   : > { %p761_p6 = pnand %p760_p4, %p754_p5 }
  0x3c   : > { %764 = shalt.err (!%p761_p6)
}
  0x3d   : > { %s765_s12 = scalar_lea.vmem %s1008_s14, 256  ;;  %s855_s20 = smov [#allocation2]  }
  0x3e   : > { %p766_p8 = scmp.ne.s32.totalorder %s1008_s14, %s765_s12  ;;  %s770_s21 = sshll.u32 %s855_s20, 4  ;;  %s771_s21 = int_to_ptr.vmem [resolvable:$false] %s770_s21 }
  0x3f   : > { %s772_s23 = scalar_lea.vmem %s771_s21, 512  ;;  %p773_p3 = scmp.lt.s32.totalorder %s1008_s14, %s771_s21 }
  0x40   : > { %p768_p10 = pnand %p766_p8, %p752_p0  ;;  %p774_p7 = scmp.lt.s32.totalorder %s772_s23, %s765_s12 }
  0x42   : > { %p769_p13 = pneg %p768_p10  ;;  %p775_p9 = por %p774_p7, %p773_p3 }
  0x44   : > { %p776_p1 = pnand %p775_p9, %p769_p13 }
  0x46   : > { %779 = shalt.err (!%p776_p1)
}
  0x47   : > { %s1156_s29 = smov 128   ;;  %p1157_p0 = scmp.ne.s32.totalorder %s1151_s9, 0 }
  0x48   : > { %668 = dma.hbm_to_vmem [thread:$0]  (!%p1004_p11), %s1002_s16, 256, %s1008_s14, %s1010_s17, %s1156_s29, %s1156_s29, %s854_s10  }
  0x49   : > { %271 = sbr.rel (%p1157_p0) target bundleno = 657 (0x291), region = 48  ;;  %s1044_s22 = sand.u32 (!%p1157_p0), 1, %s842_s25  }
  0x4a   : > { %s611_s11 = sshll.u32 (!%p1157_p0), %s1044_s22, 4  ;;  %s274_s12 = scalar_lea.sflag (!%p1157_p0), [#allocation3], %s1044_s22 }
  0x4b   : > { %s277_s15 = scalar_lea.vmem (!%p1157_p0), [#allocation2], %s611_s11  ;;  %p1158_p5 = scmp.ne.s32.totalorder (!%p1157_p0), %s1149_s30, 0 }
  0x50   : > { %825 = dma.done.wait (%p1158_p5), %s274_s12, 256  }
  0x51   : > { %827 = vsyncadd (%p1158_p5), %s274_s12, 4294967040  ;;  %p1159_p11 = scmp.eq.s32.totalorder %s920_s28, 0 }
  0x53   : > { %829 = dma.done.wait (%p1159_p11), [#allocation6], 512   ;;  %p1160_p2 = pmov %p1159_p11 }
  0x54   : > { %vm316_vm0 = vcmask 261120   ;;  %v312_v0 = vld [vmem:[%s277_s15] sm:$0xff]  ;;  %v313_v1 = vld [vmem:[%s277_s15 + $0x8] sm:$0xff]  ;;  %s627_s12 = sshll.u32 %s920_s28, 8  ;;  %s311_s15 = scalar_lea.vmem [#allocation7], %s611_s11 }
  0x55   : > { %831 = vsyncadd (%p1160_p2), [#allocation6], 4294966784  ;;  %v317_v2 = vsel %vm316_vm0, %v312_v0, 0.0  ;;  %v326_v3 = vmul.f32 %v312_v0, %v312_v0  ;;  %v327_v4 = vmul.f32 %v313_v1, %v313_v1  ;;  %v320_v6 = vsel %vm316_vm0, %v313_v1, 0.0  ;;  %v364_v8 = vld [vmem:[#allocation5] sm:$0xff]  ;;  %v365_v9 = vld [vmem:[#allocation5 + $0x8] sm:$0xff]  ;;  %s1089_s16 = scalar_lea.hbm %s1144_s7, %s627_s12 }
  0x56   : > { %318 = vadd.xlane.f32.xlu0 %v317_v2  ;;  %v366_v10 = vld [vmem:[#allocation5 + $0x10] sm:$0xff]  ;;  %v645_v11 = vpack.c.bf16 %v365_v9, %v364_v8  ;;  %v367_v12 = vld [vmem:[#allocation5 + $0x18] sm:$0xff]  ;;  %v614_v30 = vld [vmem:[%s1138_s1] ss:$0 sm:$0xff]  ;;  %s520_s30 = sshll.u32 %s311_s15, 4  ;;  %s507_s28 = scalar_lea.sflag [#allocation4], %s1044_s22  ;;  %s1091_s30 = int_to_ptr.vmem [resolvable:$true] %s520_s30 }
  0x57   : > { %v328_v5 = vsel %vm316_vm0, %v326_v3, 0.0  ;;  %v331_v7 = vsel %vm316_vm0, %v327_v4, 0.0  ;;  %v649_v13 = vpack.c.bf16 %v367_v12, %v366_v10  ;;  %v615_v32 = vld [vmem:[%s1139_s2] ss:$0 sm:$0xff]  ;;  %s780_s11 = scalar_lea.vmem %s1091_s30, 256  ;;  %s856_s14 = smov [#allocation7]  }
  0x58   : > { %329 = vadd.xlane.f32.xlu1 %v328_v5  ;;  %646 = vmatprep.subr.bf16.mxu0 %v645_v11  ;;  %v616_v40 = vld [vmem:[%s1141_s4] ss:$0 sm:$0xff]  ;;  %p781_p4 = scmp.ne.s32.totalorder %s1091_s30, %s780_s11  ;;  %s784_s17 = sshll.u32 %s856_s14, 4  ;;  %s785_s17 = int_to_ptr.vmem [resolvable:$false] %s784_s17 }
  0x59   : > { %648 = vmatpush3.bf16.msra.mxu0 %v645_v11  ;;  %v619_v4 = vld [vmem:[%s1142_s5] ss:$0 sm:$0xff]  ;;  %s786_s20 = scalar_lea.vmem %s785_s17, 512  ;;  %p787_p10 = scmp.lt.s32.totalorder %s1091_s30, %s785_s17 }
  0x5a   : > { %321 = vadd.xlane.f32.xlu0 %v320_v6  ;;  %650 = vmatprep.subr.bf16.mxu0 %v649_v13  ;;  %p782_p6 = pnand %p781_p4, %p993_p12  ;;  %p788_p13 = scmp.lt.s32.totalorder %s786_s20, %s780_s11 }
  0x5c   : > { %332 = vadd.xlane.f32.xlu1 %v331_v7  ;;  %v620_v7 = vld [vmem:[%s1143_s6] ss:$0 sm:$0xff]  ;;  %p783_p8 = pneg %p782_p6  ;;  %p789_p3 = por %p788_p13, %p787_p10 }
  0x5d   : > { %652 = vmatpush3.bf16.msra.mxu0 %v649_v13 }
  0x5e   : > { %p790_p7 = pnand %p789_p3, %p783_p8 }
  0xe3   : > { %v319_v14 = vpop.xlane.xlu0 %318 }
  0xe4   : > { %v324_v15 = vmul.f32 0.03125, %v319_v14 }
  0xe5   : > { %v330_v16 = vpop.xlane.xlu1 %329 }
  0xe6   : > { %v336_v17 = vmul.f32 %v324_v15, %v324_v15  ;;  %v334_v18 = vmul.f32 0.03125, %v330_v16  ;;  %v344_v28 = vsub.f32 %v312_v0, %v324_v15 }
  0xe7   : > { %v322_v19 = vpop.xlane.xlu0 %321 }
  0xe8   : > { %v338_v20 = vsub.f32 %v334_v18, %v336_v17  ;;  %v325_v21 = vmul.f32 0.03125, %v322_v19 }
  0xe9   : > { %v333_v22 = vpop.xlane.xlu1 %332 }
  0xea   : > { %v340_v23 = vadd.f32 1e-05, %v338_v20  ;;  %v337_v24 = vmul.f32 %v325_v21, %v325_v21  ;;  %v335_v25 = vmul.f32 0.03125, %v333_v22  ;;  %v345_v33 = vsub.f32 %v313_v1, %v325_v21 }
  0xec   : > { %714 = vrsqrt.f32 %v340_v23  ;;  %v339_v26 = vsub.f32 %v335_v25, %v337_v24 }
  0xee   : > { %v341_v27 = vadd.f32 1e-05, %v339_v26 }
  0xf0   : > { %716 = vrsqrt.f32 %v341_v27 }
  0xf6   : > { %v715_v29 = vpop.eup %714 }
  0xf7   : > { %v346_v31 = vmul.f32 %v715_v29, %v344_v28 }
  0xf9   : > { %v354_v34 = vmul.f32 %v614_v30, %v346_v31 }
  0xfa   : > { %v717_v35 = vpop.eup %716 }
  0xfb   : > { %v347_v36 = vmul.f32 %v717_v35, %v345_v33  ;;  %v362_v37 = vadd.f32 %v615_v32, %v354_v34 }
  0xfd   : > { %v355_v38 = vmul.f32 %v614_v30, %v347_v36  ;;  %642 = vmatprep.mubr.msk.f32.mxu0 %vm316_vm0, %v362_v37 }
  0xff   : > { %v363_v39 = vadd.f32 %v615_v32, %v355_v38 }
 0x101   : > { %643 = vmatmul.mubr.msk.f32.vlgmr.msra.gmra.mrb[0].mxu0 %vm316_vm0, %v363_v39 }
 0x1d4   : > { %v644_v41 = vpop.f32.mrb[0].mxu0 }
 0x1d5   : > { %v453_v42 = vadd.f32 %v644_v41, %v616_v40  ;;  %v447_v43 = vpop.f32.mrb[1].mxu0 }
 0x1d6   : > { %v448_v44 = vadd.f32 %v616_v40, %v447_v43 }
 0x1d7   : > { %v461_v45 = vsel %vm316_vm0, %v453_v42, 0.0  ;;  %v467_v46 = vmul.f32 %v453_v42, %v453_v42 }
 0x1d8   : > { %462 = vadd.xlane.f32.xlu1 %v461_v45  ;;  %v458_v47 = vsel %vm316_vm0, %v448_v44, 0.0  ;;  %v466_v48 = vmul.f32 %v448_v44, %v448_v44 }
 0x1d9   : > { %459 = vadd.xlane.f32.xlu0 %v458_v47  ;;  %v471_v49 = vsel %vm316_vm0, %v467_v46, 0.0 }
 0x1da   : > { %v468_v50 = vsel %vm316_vm0, %v466_v48, 0.0 }
 0x1dc   : > { %472 = vadd.xlane.f32.xlu1 %v471_v49 }
 0x1dd   : > { %469 = vadd.xlane.f32.xlu0 %v468_v50 }
 0x265   : > { %v463_v51 = vpop.xlane.xlu1 %462 }
 0x266   : > { %v465_v52 = vmul.f32 0.03125, %v463_v51  ;;  %v460_v53 = vpop.xlane.xlu0 %459 }
 0x267   : > { %v464_v54 = vmul.f32 0.03125, %v460_v53 }
 0x268   : > { %v477_v56 = vmul.f32 %v465_v52, %v465_v52  ;;  %v485_v1 = vsub.f32 %v453_v42, %v465_v52 }
 0x269   : > { %v473_v55 = vpop.xlane.xlu1 %472  ;;  %v476_v59 = vmul.f32 %v464_v54, %v464_v54  ;;  %v484_v3 = vsub.f32 %v448_v44, %v464_v54 }
 0x26a   : > { %v475_v57 = vmul.f32 0.03125, %v473_v55  ;;  %v470_v58 = vpop.xlane.xlu0 %469 }
 0x26b   : > { %v474_v60 = vmul.f32 0.03125, %v470_v58 }
 0x26c   : > { %v479_v61 = vsub.f32 %v475_v57, %v477_v56 }
 0x26d   : > { %v478_v62 = vsub.f32 %v474_v60, %v476_v59 }
 0x26e   : > { %v481_v63 = vadd.f32 1e-05, %v479_v61 }
 0x26f   : > { %v480_v0 = vadd.f32 1e-05, %v478_v62 }
 0x270   : > { %718 = vrsqrt.f32 %v481_v63 }
 0x271   : > { %720 = vrsqrt.f32 %v480_v0 }
 0x27a   : > { %v719_v2 = vpop.eup %718 }
 0x27b   : > { %v721_v5 = vpop.eup %720  ;;  %v487_v6 = vmul.f32 %v719_v2, %v485_v1 }
 0x27c   : > { %v486_v8 = vmul.f32 %v721_v5, %v484_v3 }
 0x27d   : > { %v495_v9 = vmul.f32 %v619_v4, %v487_v6 }
 0x27e   : > { %v494_v10 = vmul.f32 %v619_v4, %v486_v8 }
 0x27f   : > { %v503_v11 = vadd.f32 %v620_v7, %v495_v9 }
 0x280   : > { %v502_v12 = vadd.f32 %v620_v7, %v494_v10 }
 0x281   : > { %505 = vst.msk [vmem:[%s311_s15 + $0x8] sm:$0xff] %vm316_vm0, %v503_v11 }
 0x282   : > { %504 = vst.msk [vmem:[%s311_s15] sm:$0xff] %vm316_vm0, %v502_v12 }
 0x283   : > { %793 = shalt.err (!%p790_p7)
}
 0x284   : > { %s794_s21 = scalar_lea.hbm %s1089_s16, 256  ;;  %s798_s12 = scalar_lea.hbm %s1144_s7, 512 }
 0x285   : > { %p795_p9 = scmp.ne.s32.totalorder %s1089_s16, %s794_s21  ;;  %p799_p5 = scmp.lt.u32.totalorder %s1089_s16, %s1144_s7 }
 0x286   : > { %p800_p11 = scmp.lt.u32.totalorder %s798_s12, %s794_s21  ;;  %p802_p4 = scmp.lt.u32.totalorder %s794_s21, %s1089_s16 }
 0x287   : > { %p796_p1 = pnand %p795_p9, %p993_p12 }
 0x288   : > { %p801_p2 = por %p800_p11, %p799_p5 }
 0x289   : > { %p797_p0 = pneg %p796_p1 }
 0x28a   : > { %p803_p6 = por %p802_p4, %p801_p2 }
 0x28c   : > { %p804_p8 = pnand %p803_p6, %p797_p0 }
 0x28e   : > { %807 = shalt.err (!%p804_p8)
}
 0x28f   : > { %s857_s10 = smov 128   ;;  %s858_s11 = smov 8  }
 0x290   : > { %659 = dma.vmem_to_hbm [thread:$0]  (%p993_p12), %s1091_s30, 256, %s1089_s16, %s507_s28, %s857_s10, %s857_s10, %s858_s11  }
 0x291 PF: > { %s535_s14 = sand.u32 1, %s838_s24   ;;  %p1161_p10 = scmp.ne.s32.totalorder %s1150_s8, 0 }
 0x292   : > { %p1162_p13 = scmp.ge.s32.totalorder %s850_s27, 2  ;;  %s536_s17 = scalar_lea.sflag [#allocation4], %s535_s14 }
 0x294   : > { %p670_p3 = pnand %p1162_p13, %p1161_p10 }
 0x296   : > { %833 = dma.done.wait (!%p670_p3), %s536_s17, 256  }
 0x297   : > { %835 = vsyncadd (!%p670_p3), %s536_s17, 4294967040  ;;  %p21_p7 = scmp.ge.s32.totalorder %s955_s13, 4   ;;  %s1163_s24 = smov %s842_s25 }
 0x298   : > { %s1164_s25 = smov %s846_s26  ;;  %s1165_s26 = smov %s989_s18 }
 0x299   : > { %s1166_s27 = smov %s955_s13  ;;  %23 = sbr.rel (!%p21_p7) target bundleno = 6 (0x6), region = 97 }
 0x2a0   :  { %541 = vsyncpa [#allocation3], 1 }
 0x2a1   :  { %543 = vsyncpa [#allocation3 + $0x1], 1 }
 0x2a2   :  { %544 = vsyncpa [#allocation6], 1 }
 0x2a3   :  { %545 = vsyncpa [#allocation4], 1 }
 0x2a4   :  { %547 = vsyncpa [#allocation4 + $0x1], 1 }

</bundles_post_ra>
